<compile_context>
chip_gen: v7x
topology: tpu7x:2x2x1
jax: 0.10.0
libtpu: 0.0.40
codegen_flags: <defaults>
</compile_context>

<pallas_src>
import functools

import jax
import jax.numpy as jnp
from jax.experimental import pallas as pl
from jax.experimental.pallas import tpu as pltpu


def _round_up(v, m):
    return (v + m - 1) // m * m


# ---------------------------------------------------------------------------
# Fused Pallas kernel: reflect-pad + dilated conv (single matmul) + ReLU + BN
# ---------------------------------------------------------------------------

def _tdnn_block_kernel(x_ref, w_ref, p_ref, o_ref, taps_ref, *,
                       K, Cin_pad, dil, pad, T, Bt):
    """One grid step processes Bt batch elements.

    x_ref    : (Bt, Cin_pad, T)     input tile (compute dtype)
    w_ref    : (Cout, K*Cin_pad)    conv weight, taps stacked along columns
    p_ref    : (Cout, 3)            packed f32 params [bias, bn_scale, bn_shift]
    o_ref    : (Bt, Cout, T)        output tile (out dtype)
    taps_ref : (K*Cin_pad, Bt*T)    VMEM scratch: K shifted tap slices per batch
    """
    # ---- assemble the (K*Cin_pad, Bt*T) conv operand with reflect padding ----
    for b in range(Bt):                            # static unroll over batch
        x = x_ref[b]                               # (Cin_pad, T)
        c0 = b * T                                 # lane offset (128-aligned when T%128==0)
        for k in range(K):                         # static unroll over taps
            s = k * dil - pad                      # tap shift in [-pad, pad]
            r0 = k * Cin_pad                       # sublane-pack-aligned row offset
            if s == 0:
                tap = x
            elif s < 0:
                left = -s
                # tap[:, t] = x[:, left - t]  for t <  left   (reflected left edge)
                # tap[:, t] = x[:, t + s]     for t >= left   (interior)
                edge = [x[:, left - t:left - t + 1] for t in range(left)]
                tap = jnp.concatenate(edge + [x[:, :T - left]], axis=-1)
            else:
                # tap[:, t]         = x[:, t + s]      for t < T - s  (interior)
                # tap[:, T - s + j] = x[:, T - 2 - j]  for j < s      (reflected right edge)
                edge = [x[:, T - 2 - j:T - 1 - j] for j in range(s)]
                tap = jnp.concatenate([x[:, s:]] + edge, axis=-1)
            # ONE dense, tile-aligned store per (tap, batch) -- no masked vst loops.
            taps_ref[r0:r0 + Cin_pad, c0:c0 + T] = tap

    # ---- single MXU matmul over the full K*Cin contraction (f32 accumulate) ----
    y = jnp.dot(w_ref[...], taps_ref[...], preferred_element_type=jnp.float32)

    # ---- conv bias -> ReLU -> folded BatchNorm affine; Dropout(p=0) = id ----
    p = p_ref[...]
    bias, scale, shift = p[:, 0:1], p[:, 1:2], p[:, 2:3]
    y = jnp.maximum(y + bias, 0.0) * scale + shift

    for b in range(Bt):
        o_ref[b] = y[:, b * T:(b + 1) * T].astype(o_ref.dtype)


def tdnn_block(x, w, b, gamma, beta, mean, var, *, dilation, eps=1e-5,
               compute_dtype=jnp.float32, out_dtype=jnp.float32,
               batch_tile=None):
    """TDNNBlock forward.  x: (B, Cin, T), w: (Cout, Cin, K), b/gamma/beta/mean/var: (Cout,)."""
    B, Cin, T = x.shape
    Cout, Cin_w, K = w.shape
    assert Cin_w == Cin, "weight/in_channels mismatch"
    assert K % 2 == 1, "kernel size must be odd for 'same' padding"
    pad = dilation * (K - 1) // 2
    assert 0 <= pad < T and T >= 2, "reflect padding requires pad < T"

    # Sublane-pack alignment of each tap's channel block (8 f32 / 16 bf16 rows).
    pack = 16 if jnp.dtype(compute_dtype).itemsize == 2 else 8
    Cin_pad = _round_up(Cin, pack)

    # Batch-tile heuristic: batch as much work per step as possible, but keep
    # >=2 grid steps when B allows (feeds both v7x TensorCores).
    if batch_tile is None:
        batch_tile = B
        if B > 2:
            for d in range(B // 2, 0, -1):
                if B % d == 0:
                    batch_tile = d
                    break
    Bt = batch_tile
    assert B % Bt == 0, "batch_tile must divide batch"

    # Fold BatchNorm (inference) into per-channel scale/shift; pack params.
    scale = (gamma / jnp.sqrt(var + eps)).astype(jnp.float32)
    shift = (beta - mean * scale).astype(jnp.float32)
    params = jnp.stack([b.astype(jnp.float32), scale, shift], axis=1)   # (Cout, 3)

    # (Cout, Cin, K) -> (Cout, K*Cin_pad): column-stacked per tap, zero-padded
    # channels so every tap block is sublane-pack aligned.
    w2d = jnp.pad(jnp.transpose(w, (0, 2, 1)),
                  ((0, 0), (0, 0), (0, Cin_pad - Cin))).reshape(Cout, K * Cin_pad)
    w2d = w2d.astype(compute_dtype)

    xq = x.astype(compute_dtype)           # bf16 operands on v5e/v6e/v7x MXU
    if Cin_pad != Cin:
        xq = jnp.pad(xq, ((0, 0), (0, Cin_pad - Cin), (0, 0)))

    kernel = functools.partial(_tdnn_block_kernel, K=K, Cin_pad=Cin_pad,
                               dil=dilation, pad=pad, T=T, Bt=Bt)

    # Explicit VMEM budget (review: v7x scoped default is 32 MiB of 64 MiB).
    dt_c = jnp.dtype(compute_dtype).itemsize
    dt_o = jnp.dtype(out_dtype).itemsize
    vmem_est = (2 * Bt * Cin_pad * T * dt_c          # x block (double buffered)
                + 2 * Cout * K * Cin_pad * dt_c      # weight
                + 2 * Cout * 128 * 4                 # packed params (lane padded)
                + 2 * Bt * Cout * T * dt_o           # output block
                + K * Cin_pad * Bt * T * dt_c        # taps scratch
                + Cout * Bt * T * 4)                 # matmul result temporary
    vmem_limit = int(min(max(2 * vmem_est, 32 * 1024 * 1024), 64 * 1024 * 1024))

    return pl.pallas_call(
        kernel,
        out_shape=jax.ShapeDtypeStruct((B, Cout, T), out_dtype),
        grid=(B // Bt,),
        in_specs=[
            pl.BlockSpec((Bt, Cin_pad, T), lambda i: (i, 0, 0)),
            pl.BlockSpec((Cout, K * Cin_pad), lambda i: (0, 0)),
            pl.BlockSpec((Cout, 3), lambda i: (0, 0)),
        ],
        out_specs=pl.BlockSpec((Bt, Cout, T), lambda i: (i, 0, 0)),
        scratch_shapes=[pltpu.VMEM((K * Cin_pad, Bt * T), compute_dtype)],
        compiler_params=pltpu.CompilerParams(
            dimension_semantics=("parallel",),       # batch-tile axis across TCs
            vmem_limit_bytes=vmem_limit,
        ),
    )(xq, w2d, params)


# ---------------------------------------------------------------------------
# Pure-JAX reference (mirrors the PyTorch module semantics)
# ---------------------------------------------------------------------------

def tdnn_block_ref(x, w, b, gamma, beta, mean, var, *, dilation, eps=1e-5,
                   compute_dtype=jnp.float32, out_dtype=jnp.float32):
    B, Cin, T = x.shape
    Cout, _, K = w.shape
    pad = dilation * (K - 1) // 2
    xq = x.astype(compute_dtype)
    wq = w.astype(compute_dtype)
    xpad = jnp.pad(xq, ((0, 0), (0, 0), (pad, pad)), mode="reflect")
    acc = jnp.zeros((B, Cout, T), jnp.float32)
    for k in range(K):
        acc = acc + jnp.einsum("oc,bct->bot", wq[:, :, k],
                               xpad[:, :, k * dilation:k * dilation + T],
                               preferred_element_type=jnp.float32)
    y = jnp.maximum(acc + b.reshape(1, -1, 1), 0.0)
    scale = gamma / jnp.sqrt(var + eps)
    shift = beta - mean * scale
    out = y * scale.reshape(1, -1, 1) + shift.reshape(1, -1, 1)
    return out.astype(out_dtype)


# ---------------------------------------------------------------------------
# Main
# ---------------------------------------------------------------------------

def _make_inputs(key, B, Cin, Cout, K, T):
    ks = jax.random.split(key, 7)
    x = jax.random.normal(ks[0], (B, Cin, T), jnp.float32)
    w = 0.1 * jax.random.normal(ks[1], (Cout, Cin, K), jnp.float32)
    b = 0.1 * jax.random.normal(ks[2], (Cout,), jnp.float32)
    gamma = 1.0 + 0.1 * jax.random.normal(ks[3], (Cout,), jnp.float32)
    beta = 0.1 * jax.random.normal(ks[4], (Cout,), jnp.float32)
    mean = 0.1 * jax.random.normal(ks[5], (Cout,), jnp.float32)
    var = 0.5 + jax.random.uniform(ks[6], (Cout,), jnp.float32)
    return x, w, b, gamma, beta, mean, var


if __name__ == "__main__":
    key = jax.random.PRNGKey(0)
    k1, k2, k3 = jax.random.split(key, 3)

    # Lane-dense T tiles (multiples of 128); third config exercises the
    # Cin -> Cin_pad sublane-pack padding path (40 -> 48 for bf16).
    configs = [
        dict(key=k1, B=4, Cin=64, Cout=64, K=3, dil=2, T=128),
        dict(key=k2, B=2, Cin=48, Cout=64, K=5, dil=1, T=256),
        dict(key=k3, B=2, Cin=40, Cout=32, K=3, dil=3, T=128),
    ]

    for cfg in configs:
        x, w, b, gamma, beta, mean, var = _make_inputs(
            cfg["key"], cfg["B"], cfg["Cin"], cfg["Cout"], cfg["K"], cfg["T"])

        # f32 path (exact module semantics).
        out = jax.block_until_ready(
            tdnn_block(x, w, b, gamma, beta, mean, var, dilation=cfg["dil"],
                       compute_dtype=jnp.float32, out_dtype=jnp.float32))
        ref = jax.block_until_ready(
            tdnn_block_ref(x, w, b, gamma, beta, mean, var, dilation=cfg["dil"],
                           compute_dtype=jnp.float32, out_dtype=jnp.float32))
        assert out.shape == (cfg["B"], cfg["Cout"], cfg["T"])
        assert jnp.allclose(out, ref, atol=1e-3, rtol=1e-3), "f32 mismatch"

        # bf16 matmul-operand path (MXU-native on v6e/v7x); epilogue stays f32.
        out_bf = jax.block_until_ready(
            tdnn_block(x, w, b, gamma, beta, mean, var, dilation=cfg["dil"],
                       compute_dtype=jnp.bfloat16, out_dtype=jnp.float32))
        ref_bf = jax.block_until_ready(
            tdnn_block_ref(x, w, b, gamma, beta, mean, var, dilation=cfg["dil"],
                           compute_dtype=jnp.bfloat16, out_dtype=jnp.float32))
        assert jnp.allclose(out_bf, ref_bf, atol=2e-2, rtol=2e-2), "bf16 mismatch"

    # bf16 output path (cuts HBM writeback for the mem-bound regime on v6e/v7x).
    cfg = configs[0]
    x, w, b, gamma, beta, mean, var = _make_inputs(
        cfg["key"], cfg["B"], cfg["Cin"], cfg["Cout"], cfg["K"], cfg["T"])
    out16 = jax.block_until_ready(
        tdnn_block(x, w, b, gamma, beta, mean, var, dilation=cfg["dil"],
                   compute_dtype=jnp.bfloat16, out_dtype=jnp.bfloat16))
    ref16 = jax.block_until_ready(
        tdnn_block_ref(x, w, b, gamma, beta, mean, var, dilation=cfg["dil"],
                       compute_dtype=jnp.bfloat16, out_dtype=jnp.bfloat16))
    assert out16.dtype == jnp.bfloat16
    assert jnp.allclose(out16.astype(jnp.float32), ref16.astype(jnp.float32),
                        atol=6e-2, rtol=5e-2), "bf16-out mismatch"

    print("KERNEL_OK")
</pallas_src>

<mosaic_0001>
module attributes {stable_mosaic.version = 11 : i64} {
  func.func @_tdnn_block_kernel(%arg0: i32, %arg1: memref<2x64x128xf32, #tpu.memory_space<vmem>>, %arg2: memref<64x192xf32, #tpu.memory_space<vmem>>, %arg3: memref<64x3xf32, #tpu.memory_space<vmem>>, %arg4: memref<2x64x128xf32, #tpu.memory_space<vmem>>, %arg5: memref<192x256xf32, #tpu.memory_space<vmem>>) attributes {dimension_semantics = [#tpu.dimension_semantics<parallel>], iteration_bounds = array<i64: 2>, scalar_prefetch = 0 : i64, scratch_operands = 1 : i64, tpu.core_type = #tpu.core_type<tc>, window_params = [{transform_indices = @transform_0, window_bounds = array<i64: 2, 64, 128>}, {pipeline_mode = #tpu.pipeline_mode<synchronous>, transform_indices = @transform_1, window_bounds = array<i64: 64, 192>}, {pipeline_mode = #tpu.pipeline_mode<synchronous>, transform_indices = @transform_2, window_bounds = array<i64: 64, 3>}, {transform_indices = @transform_3, window_bounds = array<i64: 2, 64, 128>}]} {
    %c0 = arith.constant 0 : index
    %c0_0 = arith.constant 0 : index
    %c0_1 = arith.constant 0 : index
    %0 = vector.load %arg1[%c0, %c0_0, %c0_1] : memref<2x64x128xf32, #tpu.memory_space<vmem>>, vector<1x64x128xf32>
    %1 = vector.shape_cast %0 : vector<1x64x128xf32> to vector<64x128xf32>
    %2 = vector.extract_strided_slice %1 {offsets = [0, 2], sizes = [64, 1], strides = [1, 1]} : vector<64x128xf32> to vector<64x1xf32>
    %3 = vector.extract_strided_slice %1 {offsets = [0, 1], sizes = [64, 1], strides = [1, 1]} : vector<64x128xf32> to vector<64x1xf32>
    %4 = vector.extract_strided_slice %1 {offsets = [0, 0], sizes = [64, 126], strides = [1, 1]} : vector<64x128xf32> to vector<64x126xf32>
    %5 = tpu.concatenate %2, %3, %4 in 1 : vector<64x1xf32>, vector<64x1xf32>, vector<64x126xf32> -> vector<64x128xf32>
    %c0_2 = arith.constant 0 : index
    %c0_3 = arith.constant 0 : index
    %6 = vector.load %arg5[%c0_2, %c0_3] : memref<192x256xf32, #tpu.memory_space<vmem>>, vector<64x128xf32>
    tpu.vector_store %arg5[%c0_2, %c0_3], %5 {strides = array<i32>} : memref<192x256xf32, #tpu.memory_space<vmem>>, vector<64x128xf32>,
    %c64 = arith.constant 64 : index
    %c0_4 = arith.constant 0 : index
    %7 = vector.load %arg5[%c64, %c0_4] : memref<192x256xf32, #tpu.memory_space<vmem>>, vector<64x128xf32>
    tpu.vector_store %arg5[%c64, %c0_4], %1 {strides = array<i32>} : memref<192x256xf32, #tpu.memory_space<vmem>>, vector<64x128xf32>,
    %8 = vector.extract_strided_slice %1 {offsets = [0, 126], sizes = [64, 1], strides = [1, 1]} : vector<64x128xf32> to vector<64x1xf32>
    %9 = vector.extract_strided_slice %1 {offsets = [0, 125], sizes = [64, 1], strides = [1, 1]} : vector<64x128xf32> to vector<64x1xf32>
    %10 = vector.extract_strided_slice %1 {offsets = [0, 2], sizes = [64, 126], strides = [1, 1]} : vector<64x128xf32> to vector<64x126xf32>
    %11 = tpu.concatenate %10, %8, %9 in 1 : vector<64x126xf32>, vector<64x1xf32>, vector<64x1xf32> -> vector<64x128xf32>
    %c128 = arith.constant 128 : index
    %c0_5 = arith.constant 0 : index
    %12 = vector.load %arg5[%c128, %c0_5] : memref<192x256xf32, #tpu.memory_space<vmem>>, vector<64x128xf32>
    tpu.vector_store %arg5[%c128, %c0_5], %11 {strides = array<i32>} : memref<192x256xf32, #tpu.memory_space<vmem>>, vector<64x128xf32>,
    %c1 = arith.constant 1 : index
    %c0_6 = arith.constant 0 : index
    %c0_7 = arith.constant 0 : index
    %13 = vector.load %arg1[%c1, %c0_6, %c0_7] : memref<2x64x128xf32, #tpu.memory_space<vmem>>, vector<1x64x128xf32>
    %14 = vector.shape_cast %13 : vector<1x64x128xf32> to vector<64x128xf32>
    %15 = vector.extract_strided_slice %14 {offsets = [0, 2], sizes = [64, 1], strides = [1, 1]} : vector<64x128xf32> to vector<64x1xf32>
    %16 = vector.extract_strided_slice %14 {offsets = [0, 1], sizes = [64, 1], strides = [1, 1]} : vector<64x128xf32> to vector<64x1xf32>
    %17 = vector.extract_strided_slice %14 {offsets = [0, 0], sizes = [64, 126], strides = [1, 1]} : vector<64x128xf32> to vector<64x126xf32>
    %18 = tpu.concatenate %15, %16, %17 in 1 : vector<64x1xf32>, vector<64x1xf32>, vector<64x126xf32> -> vector<64x128xf32>
    %c0_8 = arith.constant 0 : index
    %c128_9 = arith.constant 128 : index
    %19 = vector.load %arg5[%c0_8, %c128_9] : memref<192x256xf32, #tpu.memory_space<vmem>>, vector<64x128xf32>
    tpu.vector_store %arg5[%c0_8, %c128_9], %18 {strides = array<i32>} : memref<192x256xf32, #tpu.memory_space<vmem>>, vector<64x128xf32>,
    %c64_10 = arith.constant 64 : index
    %c128_11 = arith.constant 128 : index
    %20 = vector.load %arg5[%c64_10, %c128_11] : memref<192x256xf32, #tpu.memory_space<vmem>>, vector<64x128xf32>
    tpu.vector_store %arg5[%c64_10, %c128_11], %14 {strides = array<i32>} : memref<192x256xf32, #tpu.memory_space<vmem>>, vector<64x128xf32>,
    %21 = vector.extract_strided_slice %14 {offsets = [0, 126], sizes = [64, 1], strides = [1, 1]} : vector<64x128xf32> to vector<64x1xf32>
    %22 = vector.extract_strided_slice %14 {offsets = [0, 125], sizes = [64, 1], strides = [1, 1]} : vector<64x128xf32> to vector<64x1xf32>
    %23 = vector.extract_strided_slice %14 {offsets = [0, 2], sizes = [64, 126], strides = [1, 1]} : vector<64x128xf32> to vector<64x126xf32>
    %24 = tpu.concatenate %23, %21, %22 in 1 : vector<64x126xf32>, vector<64x1xf32>, vector<64x1xf32> -> vector<64x128xf32>
    %c128_12 = arith.constant 128 : index
    %c128_13 = arith.constant 128 : index
    %25 = vector.load %arg5[%c128_12, %c128_13] : memref<192x256xf32, #tpu.memory_space<vmem>>, vector<64x128xf32>
    tpu.vector_store %arg5[%c128_12, %c128_13], %24 {strides = array<i32>} : memref<192x256xf32, #tpu.memory_space<vmem>>, vector<64x128xf32>,
    %c0_14 = arith.constant 0 : index
    %c0_15 = arith.constant 0 : index
    %26 = vector.load %arg2[%c0_14, %c0_15] : memref<64x192xf32, #tpu.memory_space<vmem>>, vector<64x192xf32>
    %c0_16 = arith.constant 0 : index
    %c0_17 = arith.constant 0 : index
    %27 = vector.load %arg5[%c0_16, %c0_17] : memref<192x256xf32, #tpu.memory_space<vmem>>, vector<192x256xf32>
    %cst = arith.constant dense<0.000000e+00> : vector<64x256xf32>
    %28 = tpu.matmul %26, %27, %cst {dimension_numbers = #tpu.dot_dimension_numbers<[1], [0], [0], [1], [0, 0, 1, 1], [], []>} : vector<64x192xf32>, vector<192x256xf32>, vector<64x256xf32> -> vector<64x256xf32>
    %c0_18 = arith.constant 0 : index
    %c0_19 = arith.constant 0 : index
    %29 = vector.load %arg3[%c0_18, %c0_19] : memref<64x3xf32, #tpu.memory_space<vmem>>, vector<64x3xf32>
    %30 = vector.extract_strided_slice %29 {offsets = [0, 0], sizes = [64, 1], strides = [1, 1]} : vector<64x3xf32> to vector<64x1xf32>
    %31 = vector.extract_strided_slice %29 {offsets = [0, 1], sizes = [64, 1], strides = [1, 1]} : vector<64x3xf32> to vector<64x1xf32>
    %32 = vector.extract_strided_slice %29 {offsets = [0, 2], sizes = [64, 1], strides = [1, 1]} : vector<64x3xf32> to vector<64x1xf32>
    %33 = vector.broadcast %30 : vector<64x1xf32> to vector<64x256xf32>
    %34 = arith.addf %28, %33 : vector<64x256xf32>
    %cst_20 = arith.constant 0.000000e+00 : f32
    %35 = vector.broadcast %cst_20 : f32 to vector<64x256xf32>
    %36 = arith.maximumf %34, %35 : vector<64x256xf32>
    %37 = vector.broadcast %31 : vector<64x1xf32> to vector<64x256xf32>
    %38 = arith.mulf %36, %37 : vector<64x256xf32>
    %39 = vector.broadcast %32 : vector<64x1xf32> to vector<64x256xf32>
    %40 = arith.addf %38, %39 : vector<64x256xf32>
    %41 = vector.extract_strided_slice %40 {offsets = [0, 0], sizes = [64, 128], strides = [1, 1]} : vector<64x256xf32> to vector<64x128xf32>
    %c0_21 = arith.constant 0 : index
    %c0_22 = arith.constant 0 : index
    %c0_23 = arith.constant 0 : index
    %42 = vector.load %arg4[%c0_21, %c0_22, %c0_23] : memref<2x64x128xf32, #tpu.memory_space<vmem>>, vector<1x64x128xf32>
    %43 = vector.shape_cast %42 : vector<1x64x128xf32> to vector<64x128xf32>
    %44 = vector.shape_cast %41 : vector<64x128xf32> to vector<1x64x128xf32>
    tpu.vector_store %arg4[%c0_21, %c0_22, %c0_23], %44 {strides = array<i32>} : memref<2x64x128xf32, #tpu.memory_space<vmem>>, vector<1x64x128xf32>,
    %45 = vector.extract_strided_slice %40 {offsets = [0, 128], sizes = [64, 128], strides = [1, 1]} : vector<64x256xf32> to vector<64x128xf32>
    %c1_24 = arith.constant 1 : index
    %c0_25 = arith.constant 0 : index
    %c0_26 = arith.constant 0 : index
    %46 = vector.load %arg4[%c1_24, %c0_25, %c0_26] : memref<2x64x128xf32, #tpu.memory_space<vmem>>, vector<1x64x128xf32>
    %47 = vector.shape_cast %46 : vector<1x64x128xf32> to vector<64x128xf32>
    %48 = vector.shape_cast %45 : vector<64x128xf32> to vector<1x64x128xf32>
    tpu.vector_store %arg4[%c1_24, %c0_25, %c0_26], %48 {strides = array<i32>} : memref<2x64x128xf32, #tpu.memory_space<vmem>>, vector<1x64x128xf32>,
    return
  }
  func.func @transform_0(%arg0: i32) -> (i32, i32, i32) {
    %c0_i32 = arith.constant 0 : i32
    %c0_i32_0 = arith.constant 0 : i32
    %c0_i32_1 = arith.constant 0 : i32
    return %arg0, %c0_i32, %c0_i32_0 : i32, i32, i32
  }
  func.func @transform_1(%arg0: i32) -> (i32, i32) {
    %c0_i32 = arith.constant 0 : i32
    %c0_i32_0 = arith.constant 0 : i32
    %c0_i32_1 = arith.constant 0 : i32
    return %c0_i32, %c0_i32_0 : i32, i32
  }
  func.func @transform_2(%arg0: i32) -> (i32, i32) {
    %c0_i32 = arith.constant 0 : i32
    %c0_i32_0 = arith.constant 0 : i32
    %c0_i32_1 = arith.constant 0 : i32
    return %c0_i32, %c0_i32_0 : i32, i32
  }
  func.func @transform_3(%arg0: i32) -> (i32, i32, i32) {
    %c0_i32 = arith.constant 0 : i32
    %c0_i32_0 = arith.constant 0 : i32
    %c0_i32_1 = arith.constant 0 : i32
    return %arg0, %c0_i32, %c0_i32_0 : i32, i32, i32
  }
}

</mosaic_0001>

<bundles_post_ra>
// kernel: tpu_custom_call.1
= control target key start
LH: loop header
LB: loop body
LE: loop exit
PB: predicated region body
PF: predicated region fallthrough
CT: control target
= control target key end

     0   :  { %8 = vsyncpa [#allocation4], 0  ;;  %s2047_s0 = inlined_call_operand.hbm [shape: f32[4,64,128], index: 0, kind: input, shape index: {}]   ;;  %s2048_s1 = inlined_call_operand.hbm [shape: f32[64,192], index: 1, kind: input, shape index: {}]   ;;  %s2049_s2 = inlined_call_operand.vmem [shape: f32[64,3], index: 2, kind: input, shape index: {}]   ;;  %s2050_s3 = inlined_call_operand.hbm [shape: f32[4,64,128], index: 3, kind: output, shape index: {}]  }
   0x1   :  { %10 = vsyncpa [#allocation4 + $0x1], 0 }
   0x2   :  { %11 = vsyncpa [#allocation7], 0 }
   0x3   :  { %12 = vsyncpa [#allocation5], 0 }
   0x4   :  { %14 = vsyncpa [#allocation5 + $0x1], 0  ;;  %s1365_s12 = smov 0   ;;  %s1367_s13 = smov 0  }
   0x5   :  { %s1369_s14 = smov 0   ;;  %s1371_s15 = smov 0  }
   0x6 LB: > { %s1386_s16 = sadd.s32 4294967295, %s1329_s15   ;;  %s929_s17 = sadd.s32 4294967294, %s1329_s15   ;;  %s1329_s15 = sphi %s1371_s15, %s2092_s15   ;;  %s1325_s14 = sphi %s1369_s14, %s2091_s14   ;;  %s1321_s13 = sphi %s1367_s13, %s2090_s13   ;;  %s1317_s12 = sphi %s1365_s12, %s2089_s12  }
   0x7   : > { %p40_p0 = scmp.ne.s32.totalorder %s1321_s13, %s1317_s12  ;;  %p2051_p1 = scmp.eq.s32.totalorder %s1386_s16, 0 }
   0x8   : > { %p112_p3 = scmp.eq.s32.totalorder %s929_s17, 1  ;;  %p930_p5 = scmp.ge.s32.totalorder %s1329_s15, 1 }
   0x9   : > { %p1395_p4 = por %p2051_p1, %p40_p0  ;;  %p119_p7 = scmp.lt.s32.totalorder %s1329_s15, 3 }
   0xa   : > { %p1400_p6 = por %p112_p3, %p40_p0  ;;  %s1331_s21 = smov [#allocation6]  }
   0xb   : > { %s2065_s18 = scalar_select %p1395_p4, 1, 0 }
   0xc   : > { %s2066_s19 = scalar_select %p1400_p6, 1, 0 }
   0xd   : > { %p1405_p8 = pnand %p930_p5, %p119_p7  ;;  %s131_s22 = sshll.u32 %s1331_s21, 4  ;;  %s1409_s22 = int_to_ptr.vmem [resolvable:$true] %s131_s22 }
   0xe   : > { %s1421_s24 = sadd.s32 1, %s1329_s15   ;;  %s27_s25 = sadd.s32 1, %s1325_s14 }
   0xf   : > { %s2067_s20 = scalar_select %p1405_p8, 1, 0 }
  0x10   : > { %p1055_p9 = pneg %p1405_p8  ;;  %s24_s26 = ssub.s32 %s1329_s15, %s1421_s24 }
  0x11   : > { %s1201_s29 = scalar_lea.hbm %s2048_s1, 2048 }
  0x12   : > { %p1416_p11 = pnand %p1055_p9, %p2051_p1  ;;  %p1202_p12 = scmp.ne.s32.totalorder %s2048_s1, %s1201_s29 }
  0x13   : > { %p1208_p5 = scmp.lt.u32.totalorder %s1201_s29, %s2048_s1 }
  0x14   : > { %p1203_p13 = pneg %p1416_p11 }
  0x16   : > { %p1204_p0 = pnand %p1203_p13, %p1202_p12 }
  0x18   : > { %p1205_p3 = pneg %p1204_p0 }
  0x1a   : > { %p1210_p7 = pnand %p1208_p5, %p1205_p3 }
  0x1c   : > { %1213 = shalt.err (!%p1210_p7)
}
  0x1d   : > { %s1214_s7 = scalar_lea.vmem %s1409_s22, 2048  ;;  %p1222_p2 = scmp.lt.s32.totalorder %s1409_s22, %s1409_s22 }
  0x1e   : > { %p1215_p9 = scmp.ne.s32.totalorder %s1409_s22, %s1214_s7  ;;  %p1223_p6 = scmp.lt.s32.totalorder %s1214_s7, %s1214_s7 }
  0x20   : > { %p1217_p10 = pnand %p1215_p9, %p1203_p13  ;;  %p1224_p4 = por %p1223_p6, %p1222_p2 }
  0x22   : > { %p1218_p1 = pneg %p1217_p10 }
  0x24   : > { %p1225_p8 = pnand %p1224_p4, %p1218_p1 }
  0x26   : > { %1228 = shalt.err (!%p1225_p8)
}
  0x27   : > { %s1332_s8 = smov 256   ;;  %s1333_s9 = smov 16  }
  0x28   : > { %1058 = dma.hbm_to_vmem [thread:$0]  (!%p1416_p11), %s2048_s1, 2048, %s1409_s22, [#allocation7], %s1332_s8, %s1332_s8, %s1333_s9  }
  0x29   : > { %p25_p2 = scmp.eq.s32.totalorder %s24_s26, 0  ;;  %p34_p1 = scmp.ne.s32.totalorder %s1325_s14, %s1321_s13 }
  0x2a   : > { %p35_p4 = scmp.eq.s32.totalorder %s1329_s15, 0  ;;  %p1068_p6 = scmp.lt.s32.totalorder %s1329_s15, 2 }
  0x2b   : > { %s1452_s17 = scalar_select %p25_p2, %s1325_s14, %s27_s25  }
  0x2c   : > { %p36_p8 = por %p35_p4, %p34_p1  ;;  %p2069_p10 = scmp.eq.s32.totalorder %s1386_s16, 1 }
  0x2d   : > { %s148_s27 = sand.u32 1, %s1325_s14   ;;  %s972_s28 = sshll.u32 %s1329_s15, 11 }
  0x2e   : > { %p1456_p12 = por %p2069_p10, %p34_p1  ;;  %s933_s29 = sshll.u32 %s148_s27, 7 }
  0x2f   : > { %s1465_s4 = scalar_lea.hbm %s2047_s0, %s972_s28  ;;  %s152_s22 = scalar_lea.vmem [#allocation3], %s933_s29 }
  0x30   : > { %s160_s25 = sshll.u32 %s152_s22, 4  ;;  %p1467_p11 = pnand %p1068_p6, %p36_p8  ;;  %s1471_s25 = int_to_ptr.vmem [resolvable:$true] %s160_s25 }
  0x31   : > { %s1473_s5 = scalar_lea.sflag [#allocation4], %s148_s27  ;;  %s1229_s6 = scalar_lea.hbm %s1465_s4, 2048 }
  0x32   : > { %p1230_p13 = scmp.ne.s32.totalorder %s1465_s4, %s1229_s6  ;;  %p1231_p0 = pneg %p1467_p11 }
  0x33   : > { %s1234_s9 = scalar_lea.hbm %s2047_s0, 4096  ;;  %p1235_p7 = scmp.lt.u32.totalorder %s1465_s4, %s2047_s0 }
  0x34   : > { %p1232_p3 = pnand %p1231_p0, %p1230_p13  ;;  %p1236_p9 = scmp.lt.u32.totalorder %s1234_s9, %s1229_s6 }
  0x35   : > { %p1238_p1 = scmp.lt.u32.totalorder %s1229_s6, %s1465_s4 }
  0x36   : > { %p1233_p5 = pneg %p1232_p3  ;;  %p1237_p2 = por %p1236_p9, %p1235_p7 }
  0x38   : > { %p1239_p4 = por %p1238_p1, %p1237_p2 }
  0x3a   : > { %p1240_p6 = pnand %p1239_p4, %p1233_p5 }
  0x3c   : > { %1243 = shalt.err (!%p1240_p6)
}
  0x3d   : > { %s1244_s27 = scalar_lea.vmem %s1471_s25, 2048  ;;  %s1334_s28 = smov [#allocation3]  }
  0x3e   : > { %p1245_p8 = scmp.ne.s32.totalorder %s1471_s25, %s1244_s27  ;;  %s1249_s29 = sshll.u32 %s1334_s28, 4  ;;  %s1250_s29 = int_to_ptr.vmem [resolvable:$false] %s1249_s29 }
  0x3f   : > { %s1251_s23 = scalar_lea.vmem %s1250_s29, 4096  ;;  %p1252_p3 = scmp.lt.s32.totalorder %s1471_s25, %s1250_s29 }
  0x40   : > { %p1247_p10 = pnand %p1245_p8, %p1231_p0  ;;  %p1253_p7 = scmp.lt.s32.totalorder %s1251_s23, %s1244_s27 }
  0x42   : > { %p1248_p13 = pneg %p1247_p10  ;;  %p1254_p9 = por %p1253_p7, %p1252_p3 }
  0x44   : > { %p1255_p2 = pnand %p1254_p9, %p1248_p13 }
  0x46   : > { %1258 = shalt.err (!%p1255_p2)
}
  0x47   : > { %s1335_s30 = smov 128   ;;  %s1336_s22 = smov 8  }
  0x48   : > { %1062 = dma.hbm_to_vmem [thread:$0]  (!%p1467_p11), %s1465_s4, 2048, %s1471_s25, %s1473_s5, %s1335_s30, %s1335_s30, %s1336_s22  }
  0x49   : > { %p2072_p0 = scmp.ne.s32.totalorder %s2067_s20, 0 }
  0x4a   : > { %s1504_s6 = sand.u32 (!%p2072_p0), 1, %s1321_s13   ;;  %p2073_p5 = scmp.ne.s32.totalorder (!%p2072_p0), %s2065_s18, 0 }
  0x4b   : > { %172 = sbr.rel (%p2072_p0) target bundleno = 522 (0x20a), region = 32  ;;  %s938_s7 = sshll.u32 (!%p2072_p0), %s1504_s6, 7 }
  0x4c   : > { %s175_s8 = scalar_lea.sflag (!%p2072_p0), [#allocation4], %s1504_s6  ;;  %s1510_s9 = scalar_lea.vmem (!%p2072_p0), [#allocation3], %s938_s7 }
  0x52   : > { %1304 = dma.done.wait (%p2073_p5), %s175_s8, 2048  }
  0x53   : > { %1306 = vsyncadd (%p2073_p5), %s175_s8, 4294965248  ;;  %p2074_p11 = scmp.eq.s32.totalorder %s1386_s16, 0 }
  0x55   : > { %1308 = dma.done.wait (%p2074_p11), [#allocation7], 2048   ;;  %p2075_p1 = pmov %p2074_p11 }
  0x56   : > { %v1521_v0 = vld [vmem:[%s1510_s9 + $0x40] sm:$0xff]  ;;  %v1524_v1 = vld [vmem:[%s1510_s9 + $0x48] sm:$0xff]  ;;  %s1337_s18 = smov 2   ;;  %s1338_s20 = smov 126   ;;  %v1539_v6 = vld [vmem:[%s1510_s9 + $0x10] sm:$0xff]  ;;  %vm564_vm0 = vcmask 523264  }
  0x57   : > { %1310 = vsyncadd (%p2075_p1), [#allocation7], 4294965248  ;;  %v1527_v2 = vld [vmem:[%s1510_s9] sm:$0xff]  ;;  %v1125_v3 = vpack.i.bf16 %v1524_v1, %v1521_v0  ;;  %v1532_v4 = vld [vmem:[%s1510_s9 + $0x8] sm:$0xff]  ;;  %v1339_v27 = vmov 0   ;;  %v1340_v35 = vmov 1  }
  0x58   : > { %v1130_v5 = vpack.i.bf16 %v1532_v4, %v1527_v2  ;;  %v1542_v7 = vld [vmem:[%s1510_s9 + $0x18] sm:$0xff]  ;;  %v1545_v8 = vld [vmem:[%s1510_s9 + $0x50] sm:$0xff]  ;;  %v1559_v12 = vld [vmem:[%s1510_s9 + $0x20] sm:$0xff]  ;;  %1196 = vset.pattern.permute.xlu1 %v1339_v27  ;;  %1195 = vset.pattern.permute.xlu0 %v1339_v27  ;;  %v1341_v36 = vmov 2   ;;  %vm271_vm1 = vcmask 7168   ;;  %vm280_vm2 = vcmask 15360  }
  0x59   : > { %1126 = vrot.lane.b32.xlu1 %v1125_v3, %s1337_s18  ;;  %1116 = vrot.lane.b32.xlu0 %v1125_v3, %s1338_s20  ;;  %v1548_v9 = vld [vmem:[%s1510_s9 + $0x58] sm:$0xff]  ;;  %v1140_v10 = vpack.i.bf16 %v1542_v7, %v1539_v6  ;;  %v1562_v13 = vld [vmem:[%s1510_s9 + $0x28] sm:$0xff]  ;;  %vm305_vm3 = vcmask 1031168   ;;  %vm314_vm4 = vcmask 1039360   ;;  %s1958_s4 = scalar_lea.vmem [#allocation8], %s938_s7  ;;  %s974_s7 = sshll.u32 %s1386_s16, 11 }
  0x5a   : > { %v1135_v11 = vpack.i.bf16 %v1548_v9, %v1545_v8  ;;  %v1565_v14 = vld [vmem:[%s1510_s9 + $0x60] sm:$0xff]  ;;  %v1568_v15 = vld [vmem:[%s1510_s9 + $0x68] sm:$0xff]  ;;  %v1160_v16 = vpack.i.bf16 %v1562_v13, %v1559_v12  ;;  %v1579_v18 = vld [vmem:[%s1510_s9 + $0x30] sm:$0xff]  ;;  %s846_s25 = sshll.u32 %s1958_s4, 4  ;;  %s1996_s5 = scalar_lea.hbm %s2050_s3, %s974_s7  ;;  %s1998_s25 = int_to_ptr.vmem [resolvable:$true] %s846_s25 }
  0x5b   : > { %v1155_v17 = vpack.i.bf16 %v1568_v15, %v1565_v14  ;;  %v1582_v19 = vld [vmem:[%s1510_s9 + $0x38] sm:$0xff]  ;;  %v1585_v20 = vld [vmem:[%s1510_s9 + $0x70] sm:$0xff]  ;;  %v453_v24 = vld [vmem:[#allocation6 + $0x8] sm:$0xff]  ;;  %s832_s10 = scalar_lea.sflag [#allocation5], %s1504_s6  ;;  %s1259_s11 = scalar_lea.vmem %s1998_s25, 2048 }
  0x5c   : > { %v1588_v21 = vld [vmem:[%s1510_s9 + $0x78] sm:$0xff]  ;;  %v1180_v22 = vpack.i.bf16 %v1582_v19, %v1579_v18  ;;  %v461_v25 = vld [vmem:[#allocation6 + $0x48] sm:$0xff]  ;;  %949 = vmatprep.mubr.msk.f32.mxu0 %vm564_vm0, %v453_v24  ;;  %v516_v28 = vld [vmem:[%s2049_s2] sm:$0xff]  ;;  %p1260_p4 = scmp.ne.s32.totalorder %s1998_s25, %s1259_s11  ;;  %s1342_s27 = smov [#allocation8]  }
  0x5d   : > { %1131 = vrot.lane.b32.xlu1 %v1130_v5, %s1337_s18  ;;  %1121 = vrot.lane.b32.xlu0 %v1130_v5, %s1338_s20  ;;  %v1175_v23 = vpack.i.bf16 %v1588_v21, %v1585_v20  ;;  %v517_v26 = vld [vmem:[%s2049_s2 + $0x8] sm:$0xff]  ;;  %v518_v29 = vld [vmem:[%s2049_s2 + $0x10] sm:$0xff]  ;;  %s1263_s28 = sshll.u32 %s1342_s27, 4  ;;  %s1264_s28 = int_to_ptr.vmem [resolvable:$false] %s1263_s28 }
  0x5e   : > { %953 = vmatprep.mubr.msk.f32.mxu1 %vm564_vm0, %v461_v25  ;;  %v519_v30 = vld [vmem:[%s2049_s2 + $0x18] sm:$0xff]  ;;  %v520_v31 = vld [vmem:[%s2049_s2 + $0x20] sm:$0xff]  ;;  %v521_v32 = vld [vmem:[%s2049_s2 + $0x28] sm:$0xff]  ;;  %p1261_p6 = pnand %p1260_p4, %p1456_p12  ;;  %s1265_s29 = scalar_lea.vmem %s1264_s28, 4096 }
  0x5f   : > { %v522_v33 = vld [vmem:[%s2049_s2 + $0x30] sm:$0xff]  ;;  %v523_v34 = vld [vmem:[%s2049_s2 + $0x38] sm:$0xff]  ;;  %p1266_p10 = scmp.lt.s32.totalorder %s1998_s25, %s1264_s28  ;;  %p1267_p13 = scmp.lt.s32.totalorder %s1265_s29, %s1259_s11 }
  0x60   : > { %p1262_p8 = pneg %p1261_p6 }
  0x61   : > { %1141 = vrot.lane.b32.xlu1 %v1140_v10, %s1338_s20  ;;  %1136 = vrot.lane.b32.xlu0 %v1135_v11, %s1338_s20  ;;  %p1268_p3 = por %p1267_p13, %p1266_p10 }
  0x63   : > { %p1269_p7 = pnand %p1268_p3, %p1262_p8 }
  0x65   : > { %1151 = vrot.lane.b32.xlu1 %v1140_v10, %s1337_s18  ;;  %1146 = vrot.lane.b32.xlu0 %v1135_v11, %s1337_s18 }
  0x69   : > { %1161 = vrot.lane.b32.xlu1 %v1160_v16, %s1338_s20  ;;  %1156 = vrot.lane.b32.xlu0 %v1155_v17, %s1338_s20 }
  0x6d   : > { %1171 = vrot.lane.b32.xlu1 %v1160_v16, %s1337_s18  ;;  %1166 = vrot.lane.b32.xlu0 %v1155_v17, %s1337_s18 }
  0x71   : > { %1181 = vrot.lane.b32.xlu1 %v1180_v22, %s1338_s20  ;;  %1176 = vrot.lane.b32.xlu0 %v1175_v23, %s1338_s20 }
  0x75   : > { %1191 = vrot.lane.b32.xlu1 %v1180_v22, %s1337_s18  ;;  %1186 = vrot.lane.b32.xlu0 %v1175_v23, %s1337_s18 }
  0x79   : > { %531 = vperm.xlu1 %1196, %v517_v26   ;;  %526 = vperm.xlu0 %1195, %v516_v28  }
  0x7d   : > { %536 = vperm.xlu1 %1196, %v518_v29   ;;  %541 = vperm.xlu0 %1195, %v519_v30  }
  0x81   : > { %546 = vperm.xlu1 %1196, %v520_v31   ;;  %551 = vperm.xlu0 %1195, %v521_v32  }
  0x85   : > { %556 = vperm.xlu1 %1196, %v522_v33   ;;  %561 = vperm.xlu0 %1195, %v523_v34  }
  0x89   : > { %1197 = vset.pattern.permute.xlu1 %v1340_v35  ;;  %1198 = vset.pattern.permute.xlu0 %v1340_v35 }
  0x8a   : > { %719 = vperm.xlu1 %1197, %v516_v28   ;;  %723 = vperm.xlu0 %1198, %v517_v26  }
  0x8e   : > { %727 = vperm.xlu1 %1197, %v518_v29   ;;  %735 = vperm.xlu0 %1198, %v520_v31  }
  0x92   : > { %731 = vperm.xlu1 %1197, %v519_v30   ;;  %743 = vperm.xlu0 %1198, %v522_v33  }
  0x96   : > { %739 = vperm.xlu1 %1197, %v521_v32   ;;  %1199 = vset.pattern.permute.xlu0 %v1341_v36 }
  0x97   : > { %767 = vperm.xlu0 %1199, %v516_v28  }
  0x9a   : > { %747 = vperm.xlu1 %1197, %v523_v34  }
  0x9b   : > { %779 = vperm.xlu0 %1199, %v519_v30  }
  0x9e   : > { %1200 = vset.pattern.permute.xlu1 %v1341_v36 }
  0x9f   : > { %771 = vperm.xlu1 %1200, %v517_v26   ;;  %787 = vperm.xlu0 %1199, %v521_v32  }
  0xa3   : > { %775 = vperm.xlu1 %1200, %v518_v29   ;;  %795 = vperm.xlu0 %1199, %v523_v34  }
  0xa7   : > { %783 = vperm.xlu1 %1200, %v520_v31  }
  0xab   : > { %791 = vperm.xlu1 %1200, %v522_v33  }
  0xcb   : > { %v1626_v37 = vpop.permute.xlu1 %1126  ;;  %v1628_v38 = vpop.permute.xlu0 %1116 }
  0xcc   : > { %v1129_v39 = vunpack.i.h.bf16 %v1626_v37  ;;  %v1128_v40 = vunpack.i.l.bf16 %v1626_v37  ;;  %v1119_v41 = vunpack.i.h.bf16 %v1628_v38  ;;  %v1118_v42 = vunpack.i.l.bf16 %v1628_v38 }
  0xce   : > { %v396_v43 = vsel %vm271_vm1, %v1118_v42, %v1521_v0  ;;  %v397_v44 = vsel %vm271_vm1, %v1119_v41, %v1524_v1 }
  0xcf   : > { %v1642_v45 = vpop.permute.xlu1 %1131  ;;  %v1644_v46 = vpop.permute.xlu0 %1121  ;;  %v404_v47 = vsel %vm280_vm2, %v396_v43, %v1128_v40  ;;  %v405_v48 = vsel %vm280_vm2, %v397_v44, %v1129_v39 }
  0xd0   : > { %v1134_v49 = vunpack.i.h.bf16 %v1642_v45  ;;  %v1133_v50 = vunpack.i.l.bf16 %v1642_v45  ;;  %v1124_v51 = vunpack.i.h.bf16 %v1644_v46  ;;  %v1123_v52 = vunpack.i.l.bf16 %v1644_v46 }
  0xd1   : > { %v975_v53 = vpack.c.bf16 %v405_v48, %v404_v47 }
  0xd2   : > { %v272_v54 = vsel %vm271_vm1, %v1123_v52, %v1527_v2  ;;  %v273_v55 = vsel %vm271_vm1, %v1124_v51, %v1532_v4 }
  0xd3   : > { %976 = vmatprep.subr.bf16.mxu0 %v975_v53  ;;  %1023 = vmatprep.subr.bf16.mxu1 %v975_v53  ;;  %v1664_v56 = vpop.permute.xlu1 %1141  ;;  %v1666_v57 = vpop.permute.xlu0 %1136  ;;  %v281_v58 = vsel %vm280_vm2, %v272_v54, %v1133_v50  ;;  %v282_v59 = vsel %vm280_vm2, %v273_v55, %v1134_v49 }
  0xd4   : > { %v1144_v60 = vunpack.i.h.bf16 %v1664_v56  ;;  %v1143_v61 = vunpack.i.l.bf16 %v1664_v56  ;;  %v1139_v62 = vunpack.i.h.bf16 %v1666_v57  ;;  %v1138_v63 = vunpack.i.l.bf16 %v1666_v57 }
  0xd5   : > { %v977_v3 = vpack.c.bf16 %v282_v59, %v281_v58 }
  0xd6   : > { %v275_v23 = vsel %vm271_vm1, %v1144_v60, %v1542_v7  ;;  %v274_v24 = vsel %vm271_vm1, %v1143_v61, %v1539_v6  ;;  %v399_v25 = vsel %vm271_vm1, %v1139_v62, %v1548_v9  ;;  %v398_v26 = vsel %vm271_vm1, %v1138_v63, %v1545_v8 }
  0xd7   : > { %978 = vmatpush1.bf16.msra.mxu0 %v977_v3  ;;  %v1678_v5 = vpop.permute.xlu1 %1151  ;;  %v1680_v10 = vpop.permute.xlu0 %1146  ;;  %1035 = vmatpush1.bf16.msra.mxu1 %v977_v3  ;;  %v431_v37 = vsel %vm305_vm3, %v1139_v62, %v1548_v9  ;;  %v308_v45 = vsel %vm305_vm3, %v1143_v61, %v1539_v6 }
  0xd8   : > { %v2063_v11 = vunpack.i.h.bf16 %v1678_v5  ;;  %v1153_v16 = vunpack.i.l.bf16 %v1678_v5  ;;  %v1149_v17 = vunpack.i.h.bf16 %v1680_v10  ;;  %v1148_v22 = vunpack.i.l.bf16 %v1680_v10 }
  0xda   : > { %v406_v27 = vsel %vm280_vm2, %v398_v26, %v1148_v22  ;;  %v407_v28 = vsel %vm280_vm2, %v399_v25, %v1149_v17  ;;  %v283_v29 = vsel %vm280_vm2, %v274_v24, %v1153_v16  ;;  %v284_v30 = vsel %vm280_vm2, %v275_v23, %v2063_v11 }
  0xdb   : > { %v1714_v31 = vpop.permute.xlu1 %1161  ;;  %v1716_v32 = vpop.permute.xlu0 %1156  ;;  %v979_v33 = vpack.c.bf16 %v407_v28, %v406_v27  ;;  %v981_v34 = vpack.c.bf16 %v284_v30, %v283_v29 }
  0xdc   : > { %v2055_v35 = vunpack.i.h.bf16 %v1714_v31  ;;  %v2054_v36 = vunpack.i.l.bf16 %v1714_v31  ;;  %v1159_v43 = vunpack.i.h.bf16 %v1716_v32  ;;  %v1158_v44 = vunpack.i.l.bf16 %v1716_v32 }
  0xdd   : > { %980 = vmatprep.subr.bf16.mxu0 %v979_v33  ;;  %1024 = vmatprep.subr.bf16.mxu1 %v979_v33 }
  0xde   : > { %982 = vmatpush1.bf16.msra.mxu0 %v981_v34  ;;  %1036 = vmatpush1.bf16.msra.mxu1 %v981_v34  ;;  %v277_v59 = vsel %vm271_vm1, %v2055_v35, %v1562_v13  ;;  %v276_v3 = vsel %vm271_vm1, %v2054_v36, %v1559_v12  ;;  %v401_v23 = vsel %vm271_vm1, %v1159_v43, %v1568_v15 }
  0xdf   : > { %v1722_v47 = vpop.permute.xlu1 %1171  ;;  %v1724_v48 = vpop.permute.xlu0 %1166  ;;  %v400_v24 = vsel %vm271_vm1, %v1158_v44, %v1565_v14 }
  0xe0   : > { %v2056_v53 = vunpack.i.h.bf16 %v1722_v47  ;;  %v2057_v54 = vunpack.i.l.bf16 %v1722_v47  ;;  %v2058_v55 = vunpack.i.h.bf16 %v1724_v48  ;;  %v2062_v58 = vunpack.i.l.bf16 %v1724_v48 }
  0xe1   : > { %v2077_v57 = vunpack.i.l.bf16 %v1724_v48 }
  0xe2   : > { %v408_v25 = vsel %vm280_vm2, %v400_v24, %v2062_v58  ;;  %v409_v26 = vsel %vm280_vm2, %v401_v23, %v2058_v55  ;;  %v285_v27 = vsel %vm280_vm2, %v276_v3, %v2057_v54  ;;  %v286_v28 = vsel %vm280_vm2, %v277_v59, %v2056_v53 }
  0xe3   : > { %v1758_v29 = vpop.permute.xlu1 %1181  ;;  %v1760_v30 = vpop.permute.xlu0 %1176  ;;  %v983_v33 = vpack.c.bf16 %v409_v26, %v408_v25  ;;  %v985_v34 = vpack.c.bf16 %v286_v28, %v285_v27 }
  0xe4   : > { %v2059_v24 = vunpack.i.h.bf16 %v1758_v29  ;;  %v2060_v36 = vunpack.i.l.bf16 %v1758_v29  ;;  %v2061_v23 = vunpack.i.h.bf16 %v1760_v30  ;;  %v2064_v35 = vunpack.i.l.bf16 %v1760_v30 }
  0xe5   : > { %984 = vmatprep.subr.bf16.mxu0 %v983_v33  ;;  %1025 = vmatprep.subr.bf16.mxu1 %v983_v33  ;;  %v2082_v32 = vunpack.i.l.bf16 %v1760_v30 }
  0xe6   : > { %986 = vmatpush1.bf16.msra.mxu0 %v985_v34  ;;  %1037 = vmatpush1.bf16.msra.mxu1 %v985_v34  ;;  %v279_v28 = vsel %vm271_vm1, %v2059_v24, %v1582_v19  ;;  %v278_v33 = vsel %vm271_vm1, %v2060_v36, %v1579_v18  ;;  %v403_v34 = vsel %vm271_vm1, %v2061_v23, %v1588_v21 }
  0xe7   : > { %v1766_v3 = vpop.permute.xlu1 %1191  ;;  %v1768_v59 = vpop.permute.xlu0 %1186  ;;  %v402_v54 = vsel %vm271_vm1, %v2064_v35, %v1585_v20  ;;  %v991_v35 = vpack.c.bf16 %v1524_v1, %v1521_v0 }
  0xe8   : > { %v1194_v53 = vunpack.i.h.bf16 %v1766_v3  ;;  %v1193_v25 = vunpack.i.l.bf16 %v1766_v3  ;;  %v1189_v26 = vunpack.i.h.bf16 %v1768_v59  ;;  %v1188_v27 = vunpack.i.l.bf16 %v1768_v59  ;;  %v454_v3 = vld [vmem:[#allocation6 + $0x10] sm:$0xff] }
  0xea   : > { %v410_v55 = vsel %vm280_vm2, %v402_v54, %v1188_v27  ;;  %v411_v24 = vsel %vm280_vm2, %v403_v34, %v1189_v26  ;;  %v287_v36 = vsel %vm280_vm2, %v278_v33, %v1193_v25  ;;  %v288_v23 = vsel %vm280_vm2, %v279_v28, %v1194_v53 }
  0xeb   : > { %v987_v58 = vpack.c.bf16 %v411_v24, %v410_v55  ;;  %v989_v11 = vpack.c.bf16 %v288_v23, %v287_v36  ;;  %v993_v54 = vpack.c.bf16 %v1532_v4, %v1527_v2  ;;  %v995_v33 = vpack.c.bf16 %v1548_v9, %v1545_v8 }
  0xec   : > { %v997_v36 = vpack.c.bf16 %v1542_v7, %v1539_v6  ;;  %v999_v55 = vpack.c.bf16 %v1568_v15, %v1565_v14  ;;  %v1003_v24 = vpack.c.bf16 %v1588_v21, %v1585_v20  ;;  %v439_v9 = vsel %vm314_vm4, %v431_v37, %v1149_v17 }
  0xed   : > { %988 = vmatprep.subr.bf16.mxu0 %v987_v58  ;;  %1026 = vmatprep.subr.bf16.mxu1 %v987_v58  ;;  %v1001_v58 = vpack.c.bf16 %v1562_v13, %v1559_v12  ;;  %v2076_v6 = vunpack.i.h.bf16 %v1678_v5  ;;  %v2081_v17 = vunpack.i.h.bf16 %v1760_v30 }
  0xee   : > { %990 = vmatpush1.bf16.msra.mxu0 %v989_v11  ;;  %1038 = vmatpush1.bf16.msra.mxu1 %v989_v11  ;;  %v429_v11 = vsel %vm305_vm3, %v1119_v41, %v1524_v1  ;;  %v306_v41 = vsel %vm305_vm3, %v1123_v52, %v1527_v2 }
  0xef   : > { %992 = vmatprep.subr.bf16.mxu0 %v991_v35  ;;  %1027 = vmatprep.subr.bf16.mxu1 %v991_v35  ;;  %v428_v35 = vsel %vm305_vm3, %v1118_v42, %v1521_v0  ;;  %v437_v38 = vsel %vm314_vm4, %v429_v11, %v1129_v39  ;;  %v307_v0 = vsel %vm305_vm3, %v1124_v51, %v1532_v4  ;;  %v459_v11 = vld [vmem:[#allocation6 + $0x38] sm:$0xff] }
  0xf0   : > { %v436_v1 = vsel %vm314_vm4, %v428_v35, %v1128_v40  ;;  %v1005_v42 = vpack.c.bf16 %v1582_v19, %v1579_v18  ;;  %v430_v4 = vsel %vm305_vm3, %v1138_v63, %v1545_v8  ;;  %v315_v2 = vsel %vm314_vm4, %v306_v41, %v1133_v50  ;;  %v467_v35 = vld [vmem:[#allocation6 + $0x78] sm:$0xff] }
  0xf1   : > { %v1007_v39 = vpack.c.bf16 %v437_v38, %v436_v1  ;;  %v316_v40 = vsel %vm314_vm4, %v307_v0, %v1134_v49  ;;  %v438_v46 = vsel %vm314_vm4, %v430_v4, %v1148_v22  ;;  %v309_v8 = vsel %vm305_vm3, %v1144_v60, %v1542_v7 }
  0xf2   : > { %994 = vmatpush1.bf16.msra.mxu0 %v993_v54  ;;  %1039 = vmatpush1.bf16.msra.mxu1 %v993_v54  ;;  %v433_v49 = vsel %vm305_vm3, %v1159_v43, %v1568_v15  ;;  %v432_v50 = vsel %vm305_vm3, %v1158_v44, %v1565_v14  ;;  %v1009_v51 = vpack.c.bf16 %v316_v40, %v315_v2  ;;  %v2078_v15 = vunpack.i.h.bf16 %v1724_v48  ;;  %v463_v54 = vld [vmem:[#allocation6 + $0x58] sm:$0xff] }
  0xf3   : > { %996 = vmatprep.subr.bf16.mxu0 %v995_v33  ;;  %1028 = vmatprep.subr.bf16.mxu1 %v995_v33  ;;  %v1011_v52 = vpack.c.bf16 %v439_v9, %v438_v46  ;;  %v317_v7 = vsel %vm314_vm4, %v308_v45, %v1153_v16  ;;  %v318_v56 = vsel %vm314_vm4, %v309_v8, %v2076_v6  ;;  %v2079_v14 = vunpack.i.h.bf16 %v1714_v31  ;;  %v465_v33 = vld [vmem:[#allocation6 + $0x68] sm:$0xff] }
  0xf4   : > { %v440_v60 = vsel %vm314_vm4, %v432_v50, %v2077_v57  ;;  %v441_v61 = vsel %vm314_vm4, %v433_v49, %v2078_v15  ;;  %v2080_v63 = vunpack.i.l.bf16 %v1714_v31  ;;  %v1013_v10 = vpack.c.bf16 %v318_v56, %v317_v7 }
  0xf5   : > { %v311_v62 = vsel %vm305_vm3, %v2079_v14, %v1562_v13  ;;  %v1015_v16 = vpack.c.bf16 %v441_v61, %v440_v60  ;;  %v435_v22 = vsel %vm305_vm3, %v2081_v17, %v1588_v21  ;;  %v434_v43 = vsel %vm305_vm3, %v2082_v32, %v1585_v20 }
  0xf6   : > { %998 = vmatpush1.bf16.msra.mxu0 %v997_v36  ;;  %1040 = vmatpush1.bf16.msra.mxu1 %v997_v36  ;;  %v310_v5 = vsel %vm305_vm3, %v2080_v63, %v1559_v12  ;;  %v2083_v44 = vunpack.i.l.bf16 %v1722_v47  ;;  %v2084_v31 = vunpack.i.h.bf16 %v1722_v47  ;;  %v442_v48 = vsel %vm314_vm4, %v434_v43, %v1188_v27  ;;  %v460_v27 = vld [vmem:[#allocation6 + $0x40] sm:$0xff] }
  0xf7   : > { %1000 = vmatprep.subr.bf16.mxu0 %v999_v55  ;;  %1029 = vmatprep.subr.bf16.mxu1 %v999_v55  ;;  %v443_v21 = vsel %vm314_vm4, %v435_v22, %v1189_v26  ;;  %v2085_v20 = vunpack.i.h.bf16 %v1758_v29  ;;  %v2086_v47 = vunpack.i.l.bf16 %v1758_v29  ;;  %v452_v29 = vld [vmem:[#allocation6] sm:$0xff] }
  0xf8   : > { %v319_v13 = vsel %vm314_vm4, %v310_v5, %v2083_v44  ;;  %v320_v12 = vsel %vm314_vm4, %v311_v62, %v2084_v31  ;;  %v1019_v34 = vpack.c.bf16 %v443_v21, %v442_v48  ;;  %v456_v36 = vld [vmem:[#allocation6 + $0x20] sm:$0xff]  ;;  %v532_v1 = vpop.permute.xlu1 %531  ;;  %v527_v41 = vpop.permute.xlu0 %526 }
  0xf9   : > { %v313_v30 = vsel %vm305_vm3, %v2085_v20, %v1582_v19  ;;  %v312_v23 = vsel %vm305_vm3, %v2086_v47, %v1579_v18  ;;  %v1017_v28 = vpack.c.bf16 %v320_v12, %v319_v13  ;;  %v455_v18 = vld [vmem:[#allocation6 + $0x18] sm:$0xff]  ;;  %v464_v55 = vld [vmem:[#allocation6 + $0x60] sm:$0xff] }
  0xfa   : > { %1002 = vmatpush1.bf16.msra.mxu0 %v1001_v58  ;;  %1041 = vmatpush1.bf16.msra.mxu1 %v1001_v58  ;;  %v321_v59 = vsel %vm314_vm4, %v312_v23, %v1193_v25  ;;  %v322_v26 = vsel %vm314_vm4, %v313_v30, %v1194_v53  ;;  %v462_v25 = vld [vmem:[#allocation6 + $0x50] sm:$0xff]  ;;  %v457_v53 = vld [vmem:[#allocation6 + $0x28] sm:$0xff] }
  0xfb   : > { %1004 = vmatprep.subr.bf16.mxu0 %v1003_v24  ;;  %1030 = vmatprep.subr.bf16.mxu1 %v1003_v24  ;;  %v1021_v19 = vpack.c.bf16 %v322_v26, %v321_v59  ;;  %v458_v58 = vld [vmem:[#allocation6 + $0x30] sm:$0xff] }
  0xfc   : > { %v466_v24 = vld [vmem:[#allocation6 + $0x70] sm:$0xff]  ;;  %v1936_v38 = vpop.permute.xlu1 %536  ;;  %v1940_v37 = vpop.permute.xlu0 %541 }
  0xfe   : > { %1006 = vmatpush1.bf16.msra.mxu0 %v1005_v42  ;;  %1042 = vmatpush1.bf16.msra.mxu1 %v1005_v42 }
  0xff   : > { %1008 = vmatprep.subr.bf16.mxu0 %v1007_v39  ;;  %1031 = vmatprep.subr.bf16.mxu1 %v1007_v39 }
 0x100   : > { %v547_v0 = vpop.permute.xlu1 %546  ;;  %v552_v39 = vpop.permute.xlu0 %551 }
 0x102   : > { %1010 = vmatpush1.bf16.msra.mxu0 %v1009_v51  ;;  %1043 = vmatpush1.bf16.msra.mxu1 %v1009_v51 }
 0x103   : > { %1012 = vmatprep.subr.bf16.mxu0 %v1011_v52  ;;  %1032 = vmatprep.subr.bf16.mxu1 %v1011_v52 }
 0x104   : > { %v1938_v42 = vpop.permute.xlu1 %556  ;;  %v1944_v40 = vpop.permute.xlu0 %561 }
 0x106   : > { %1014 = vmatpush1.bf16.msra.mxu0 %v1013_v10  ;;  %1044 = vmatpush1.bf16.msra.mxu1 %v1013_v10 }
 0x107   : > { %1016 = vmatprep.subr.bf16.mxu0 %v1015_v16  ;;  %1033 = vmatprep.subr.bf16.mxu1 %v1015_v16 }
 0x109   : > { %v720_v4 = vpop.permute.xlu1 %719  ;;  %v724_v9 = vpop.permute.xlu0 %723 }
 0x10a   : > { %1018 = vmatpush1.bf16.msra.mxu0 %v1017_v28  ;;  %1045 = vmatpush1.bf16.msra.mxu1 %v1017_v28 }
 0x10b   : > { %1020 = vmatprep.subr.bf16.mxu0 %v1019_v34  ;;  %1034 = vmatprep.subr.bf16.mxu1 %v1019_v34 }
 0x10d   : > { %v1942_v2 = vpop.permute.xlu1 %727  ;;  %v736_v45 = vpop.permute.xlu0 %735 }
 0x10e   : > { %1022 = vmatpush1.bf16.msra.mxu0 %v1021_v19  ;;  %1046 = vmatpush1.bf16.msra.mxu1 %v1021_v19 }
 0x111   : > { %654 = vmatmul.mubr.f32.vlgmr.msra.gmra.mrb[0].mxu0 %v452_v29  ;;  %678 = vmatmul.mubr.f32.vlgmr.msra.gmra.mrb[0].mxu1 %v460_v27  ;;  %v1946_v46 = vpop.permute.xlu1 %731  ;;  %v1950_v50 = vpop.permute.xlu0 %743 }
 0x112   : > { %950 = vmatprep.mubr.msk.f32.mxu0 %vm564_vm0, %v455_v18  ;;  %954 = vmatprep.mubr.msk.f32.mxu1 %vm564_vm0, %v463_v54 }
 0x115   : > { %660 = vmatmul.mubr.f32.gmra.mrb[2].mxu0 %v454_v3  ;;  %684 = vmatmul.mubr.f32.gmra.mrb[2].mxu1 %v462_v25  ;;  %v740_v8 = vpop.permute.xlu1 %739 }
 0x116   : > { %951 = vmatprep.mubr.msk.f32.mxu0 %vm564_vm0, %v457_v53  ;;  %955 = vmatprep.mubr.msk.f32.mxu1 %vm564_vm0, %v465_v33  ;;  %v768_v52 = vpop.permute.xlu0 %767 }
 0x119   : > { %666 = vmatmul.mubr.f32.gmra.mrb[4].mxu0 %v456_v36  ;;  %690 = vmatmul.mubr.f32.gmra.mrb[4].mxu1 %v464_v55  ;;  %v1948_v49 = vpop.permute.xlu1 %747 }
 0x11a   : > { %952 = vmatprep.mubr.msk.f32.mxu0 %vm564_vm0, %v459_v11  ;;  %956 = vmatprep.mubr.msk.f32.mxu1 %vm564_vm0, %v467_v35  ;;  %v1954_v63 = vpop.permute.xlu0 %779 }
 0x11d   : > { %672 = vmatmul.mubr.f32.gmra.mrb[6].mxu0 %v458_v58  ;;  %696 = vmatmul.mubr.f32.gmra.mrb[6].mxu1 %v466_v24 }
 0x11e   : > { %v772_v51 = vpop.permute.xlu1 %771  ;;  %v788_v35 = vpop.permute.xlu0 %787 }
 0x122   : > { %v1952_v7 = vpop.permute.xlu1 %775 }
 0x126   : > { %v784_v30 = vpop.permute.xlu1 %783 }
 0x1e4   : > { %v655_v6 = vpop.f32.mrb[0].mxu0  ;;  %v679_v56 = vpop.f32.mrb[0].mxu1 }
 0x1e5   : > { %v656_v57 = vadd.f32 %v655_v6, %v527_v41  ;;  %v680_v60 = vadd.f32 %v679_v56, %v547_v0  ;;  %v657_v15 = vpop.f32.mrb[1].mxu0  ;;  %v681_v61 = vpop.f32.mrb[1].mxu1 }
 0x1e6   : > { %v658_v14 = vadd.f32 %v657_v15, %v527_v41  ;;  %v682_v62 = vadd.f32 %v681_v61, %v547_v0 }
 0x1e7   : > { %v702_v5 = vmax.f32 %v656_v57, 0.0  ;;  %v710_v10 = vmax.f32 %v680_v60, 0.0 }
 0x1e8   : > { %v703_v16 = vmax.f32 %v658_v14, 0.0  ;;  %v711_v17 = vmax.f32 %v682_v62, 0.0  ;;  %v661_v22 = vpop.f32.mrb[2].mxu0  ;;  %v685_v32 = vpop.f32.mrb[2].mxu1 }
 0x1e9   : > { %v750_v43 = vmul.f32 %v720_v4, %v702_v5  ;;  %v758_v44 = vmul.f32 %v736_v45, %v710_v10  ;;  %v662_v13 = vadd.f32 %v661_v22, %v532_v1  ;;  %v686_v31 = vadd.f32 %v685_v32, %v552_v39  ;;  %v663_v12 = vpop.f32.mrb[3].mxu0  ;;  %v687_v48 = vpop.f32.mrb[3].mxu1 }
 0x1ea   : > { %v751_v21 = vmul.f32 %v720_v4, %v703_v16  ;;  %v759_v20 = vmul.f32 %v736_v45, %v711_v17  ;;  %v664_v47 = vadd.f32 %v663_v12, %v532_v1  ;;  %v688_v23 = vadd.f32 %v687_v48, %v552_v39 }
 0x1eb   : > { %v798_v28 = vadd.f32 %v768_v52, %v750_v43  ;;  %v806_v34 = vadd.f32 %v784_v30, %v758_v44  ;;  %v704_v59 = vmax.f32 %v662_v13, 0.0  ;;  %v712_v26 = vmax.f32 %v686_v31, 0.0 }
 0x1ec   : > { %v799_v19 = vadd.f32 %v768_v52, %v751_v21  ;;  %v807_v29 = vadd.f32 %v784_v30, %v759_v20  ;;  %v705_v27 = vmax.f32 %v664_v47, 0.0  ;;  %v713_v18 = vmax.f32 %v688_v23, 0.0  ;;  %v667_v54 = vpop.f32.mrb[4].mxu0  ;;  %v691_v3 = vpop.f32.mrb[4].mxu1 }
 0x1ed   : > { %814 = vst [vmem:[%s1958_s4] sm:$0xff] %v798_v28  ;;  %818 = vst [vmem:[%s1958_s4 + $0x20] sm:$0xff] %v806_v34  ;;  %v752_v25 = vmul.f32 %v724_v9, %v704_v59  ;;  %v760_v53 = vmul.f32 %v740_v8, %v712_v26  ;;  %v668_v33 = vadd.f32 %v667_v54, %v1936_v38  ;;  %v669_v55 = vpop.f32.mrb[5].mxu0  ;;  %v693_v11 = vpop.f32.mrb[5].mxu1 }
 0x1ee   : > { %v692_v36 = vadd.f32 %v691_v3, %v1938_v42  ;;  %957 = vst [vmem:[%s1958_s4 + $0x40] sm:$0xff] %v799_v19  ;;  %961 = vst [vmem:[%s1958_s4 + $0x60] sm:$0xff] %v807_v29  ;;  %v753_v58 = vmul.f32 %v724_v9, %v705_v27  ;;  %v761_v24 = vmul.f32 %v740_v8, %v713_v18 }
 0x1ef   : > { %v670_v1 = vadd.f32 %v669_v55, %v1936_v38  ;;  %v694_v0 = vadd.f32 %v693_v11, %v1938_v42  ;;  %v800_v41 = vadd.f32 %v772_v51, %v752_v25  ;;  %v808_v4 = vadd.f32 %v788_v35, %v760_v53 }
 0x1f0   : > { %v706_v39 = vmax.f32 %v668_v33, 0.0  ;;  %v714_v45 = vmax.f32 %v692_v36, 0.0  ;;  %v801_v52 = vadd.f32 %v772_v51, %v753_v58  ;;  %v809_v6 = vadd.f32 %v788_v35, %v761_v24  ;;  %v673_v60 = vpop.f32.mrb[6].mxu0  ;;  %v697_v15 = vpop.f32.mrb[6].mxu1 }
 0x1f1   : > { %v707_v56 = vmax.f32 %v670_v1, 0.0  ;;  %v715_v57 = vmax.f32 %v694_v0, 0.0  ;;  %815 = vst [vmem:[%s1958_s4 + $0x8] sm:$0xff] %v800_v41  ;;  %819 = vst [vmem:[%s1958_s4 + $0x28] sm:$0xff] %v808_v4  ;;  %v674_v42 = vadd.f32 %v673_v60, %v1940_v37  ;;  %v698_v8 = vadd.f32 %v697_v15, %v1944_v40  ;;  %v675_v61 = vpop.f32.mrb[7].mxu0  ;;  %v699_v14 = vpop.f32.mrb[7].mxu1 }
 0x1f2   : > { %v754_v9 = vmul.f32 %v1942_v2, %v706_v39  ;;  %v762_v38 = vmul.f32 %v1950_v50, %v714_v45  ;;  %958 = vst [vmem:[%s1958_s4 + $0x48] sm:$0xff] %v801_v52  ;;  %962 = vst [vmem:[%s1958_s4 + $0x68] sm:$0xff] %v809_v6  ;;  %v792_v51 = vpop.permute.xlu1 %791  ;;  %v676_v10 = vadd.f32 %v675_v61, %v1940_v37 }
 0x1f3   : > { %v755_v62 = vmul.f32 %v1942_v2, %v707_v56  ;;  %v763_v5 = vmul.f32 %v1950_v50, %v715_v57  ;;  %v700_v16 = vadd.f32 %v699_v14, %v1944_v40  ;;  %v708_v32 = vmax.f32 %v674_v42, 0.0  ;;  %v796_v40 = vpop.permute.xlu0 %795 }
 0x1f4   : > { %v802_v17 = vadd.f32 %v1952_v7, %v754_v9  ;;  %v810_v22 = vadd.f32 %v792_v51, %v762_v38  ;;  %v716_v43 = vmax.f32 %v698_v8, 0.0  ;;  %v709_v31 = vmax.f32 %v676_v10, 0.0 }
 0x1f5   : > { %v803_v44 = vadd.f32 %v1952_v7, %v755_v62  ;;  %v811_v13 = vadd.f32 %v792_v51, %v763_v5  ;;  %v717_v12 = vmax.f32 %v700_v16, 0.0  ;;  %v756_v37 = vmul.f32 %v1946_v46, %v708_v32 }
 0x1f6   : > { %816 = vst [vmem:[%s1958_s4 + $0x10] sm:$0xff] %v802_v17  ;;  %820 = vst [vmem:[%s1958_s4 + $0x30] sm:$0xff] %v810_v22  ;;  %v764_v2 = vmul.f32 %v1948_v49, %v716_v43  ;;  %v757_v50 = vmul.f32 %v1946_v46, %v709_v31 }
 0x1f7   : > { %959 = vst [vmem:[%s1958_s4 + $0x50] sm:$0xff] %v803_v44  ;;  %963 = vst [vmem:[%s1958_s4 + $0x70] sm:$0xff] %v811_v13  ;;  %v765_v7 = vmul.f32 %v1948_v49, %v717_v12  ;;  %v804_v48 = vadd.f32 %v1954_v63, %v756_v37 }
 0x1f8   : > { %v812_v21 = vadd.f32 %v796_v40, %v764_v2  ;;  %v805_v20 = vadd.f32 %v1954_v63, %v757_v50 }
 0x1f9   : > { %v813_v30 = vadd.f32 %v796_v40, %v765_v7  ;;  %817 = vst [vmem:[%s1958_s4 + $0x18] sm:$0xff] %v804_v48 }
 0x1fa   : > { %821 = vst [vmem:[%s1958_s4 + $0x38] sm:$0xff] %v812_v21  ;;  %960 = vst [vmem:[%s1958_s4 + $0x58] sm:$0xff] %v805_v20 }
 0x1fb   : > { %964 = vst [vmem:[%s1958_s4 + $0x78] sm:$0xff] %v813_v30 }
 0x1fc   : > { %1272 = shalt.err (!%p1269_p7)
}
 0x1fd   : > { %s1273_s23 = scalar_lea.hbm %s1996_s5, 2048  ;;  %s1277_s8 = scalar_lea.hbm %s2050_s3, 4096 }
 0x1fe   : > { %p1274_p9 = scmp.ne.s32.totalorder %s1996_s5, %s1273_s23  ;;  %p1278_p5 = scmp.lt.u32.totalorder %s1996_s5, %s2050_s3 }
 0x1ff   : > { %p1279_p11 = scmp.lt.u32.totalorder %s1277_s8, %s1273_s23  ;;  %p1281_p4 = scmp.lt.u32.totalorder %s1273_s23, %s1996_s5 }
 0x200   : > { %p1275_p2 = pnand %p1274_p9, %p1456_p12 }
 0x201   : > { %p1280_p1 = por %p1279_p11, %p1278_p5 }
 0x202   : > { %p1276_p0 = pneg %p1275_p2 }
 0x203   : > { %p1282_p6 = por %p1281_p4, %p1280_p1 }
 0x205   : > { %p1283_p8 = pnand %p1282_p6, %p1276_p0 }
 0x207   : > { %1286 = shalt.err (!%p1283_p8)
}
 0x208   : > { %s1343_s20 = smov 128   ;;  %s1344_s4 = smov 8  }
 0x209   : > { %1053 = dma.vmem_to_hbm [thread:$0]  (%p1456_p12), %s1998_s25, 2048, %s1996_s5, %s832_s10, %s1343_s20, %s1343_s20, %s1344_s4  }
 0x20a PF: > { %s861_s7 = sand.u32 1, %s1317_s12   ;;  %p2087_p10 = scmp.ne.s32.totalorder %s2066_s19, 0 }
 0x20b   : > { %p2088_p13 = scmp.ge.s32.totalorder %s1329_s15, 2  ;;  %s862_s16 = scalar_lea.sflag [#allocation5], %s861_s7 }
 0x20d   : > { %p1064_p3 = pnand %p2088_p13, %p2087_p10 }
 0x20f   : > { %1312 = dma.done.wait (!%p1064_p3), %s862_s16, 2048  }
 0x210   : > { %1314 = vsyncadd (!%p1064_p3), %s862_s16, 4294965248  ;;  %p17_p7 = scmp.ge.s32.totalorder %s1421_s24, 4   ;;  %s2089_s12 = smov %s1321_s13 }
 0x211   : > { %s2090_s13 = smov %s1325_s14  ;;  %s2091_s14 = smov %s1452_s17 }
 0x212   : > { %s2092_s15 = smov %s1421_s24  ;;  %19 = sbr.rel (!%p17_p7) target bundleno = 6 (0x6), region = 83 }
 0x219   :  { %867 = vsyncpa [#allocation4], 1 }
 0x21a   :  { %869 = vsyncpa [#allocation4 + $0x1], 1 }
 0x21b   :  { %870 = vsyncpa [#allocation7], 1 }
 0x21c   :  { %871 = vsyncpa [#allocation5], 1 }
 0x21d   :  { %873 = vsyncpa [#allocation5 + $0x1], 1 }

</bundles_post_ra>
